<compile_context>
chip_gen: v5e
topology: v5e:2x2
jax: 0.10.0
libtpu: 0.0.40
codegen_flags: <defaults>
</compile_context>

<pallas_src>
import jax
import jax.numpy as jnp
from jax import lax
from jax.experimental import pallas as pl
from jax.experimental.pallas import tpu as pltpu


def _encoder_kernel(x_ref, w_ref, b_ref, o_ref, act_ref):
    """Fused n_layers affine stack.  grid = (batch_tiles, n_layers).

    x_ref  : (tm, D)    f32   input batch tile (block index constant over l ->
                              DMA'd once per batch tile, not per layer)
    w_ref  : (1, D, D)  bf16  layer-l weight, PyTorch (out_features, in_features)
    b_ref  : (1, 1, D)  f32   layer-l bias row
    o_ref  : (tm, D)    f32   output tile (resident across the layer axis)
    act_ref: (tm, D)    f32   VMEM-resident activation carried across layers
    """
    l = pl.program_id(1)

    @pl.when(l == 0)
    def _():
        act_ref[...] = x_ref[...].astype(jnp.float32)

    # x @ W.T on the MXU: bf16 operands, f32 accumulate.  Contracting W on its
    # second axis avoids materializing a transposed weight copy.
    acc = lax.dot_general(
        act_ref[...].astype(jnp.bfloat16),
        w_ref[0],
        dimension_numbers=(((1,), (1,)), ((), ())),
        preferred_element_type=jnp.float32,
    )
    # dropout p=0.0 (module default) is an exact identity -> no mask applied.
    # TODO(synk): training-mode dropout (p > 0) would use pltpu.prng_seed +
    # pltpu.stateful_bernoulli with 1/(1-p) scaling inside this kernel.
    act_ref[...] = acc + b_ref[0].astype(jnp.float32)

    @pl.when(l == pl.num_programs(1) - 1)
    def _():
        o_ref[...] = act_ref[...].astype(o_ref.dtype)


def _encoder_pallas(x, w_stack, b_stack, *, block_b=128):
    """x: (B, D) f32, w_stack: (L, D, D) bf16 (PyTorch layout), b_stack: (L, 1, D) f32."""
    B, D = x.shape
    L = w_stack.shape[0]

    tm = max(8, min(block_b, B))
    pad = (-B) % tm
    if pad:
        x = jnp.pad(x, ((0, pad), (0, 0)))
    Bp = B + pad
    nb = Bp // tm

    # Explicit VMEM budget (double-buffered x/w/b/out + f32 activation scratch).
    # TODO(synk): for very large D (f32 >= ~2.8K on v7x) the weight's N dim
    # should additionally be tiled with its own grid axis.
    vmem_bytes = (
        2 * tm * D * 4
        + 2 * D * D * w_stack.dtype.itemsize
        + 2 * D * 4
        + 2 * tm * D * 4
        + tm * D * 4
    )
    vmem_limit = min(max(4 * vmem_bytes, 32 * 1024 * 1024), 64 * 1024 * 1024)

    cost = pl.CostEstimate(
        flops=2 * L * Bp * D * D,
        transcendentals=0,
        bytes_accessed=(2 * Bp * D * 4                      # x in + out
                        + L * D * D * w_stack.dtype.itemsize  # weights
                        + L * D * 4),                          # biases
    )

    out = pl.pallas_call(
        _encoder_kernel,
        out_shape=jax.ShapeDtypeStruct((Bp, D), jnp.float32),
        grid_spec=pltpu.PrefetchScalarGridSpec(
            num_scalar_prefetch=0,
            grid=(nb, L),
            in_specs=[
                pl.BlockSpec((tm, D), lambda b, l: (b, 0)),
                pl.BlockSpec((1, D, D), lambda b, l: (l, 0, 0)),
                pl.BlockSpec((1, 1, D), lambda b, l: (l, 0, 0)),
            ],
            out_specs=pl.BlockSpec((tm, D), lambda b, l: (b, 0)),
            scratch_shapes=[pltpu.VMEM((tm, D), jnp.float32)],
        ),
        compiler_params=pltpu.CompilerParams(
            dimension_semantics=("parallel", "arbitrary"),
            vmem_limit_bytes=vmem_limit,
        ),
        cost_estimate=cost,
    )(x, w_stack, b_stack)

    if pad:
        out = out[:B]
    return out


def init_encoder_params(key, dim, n_layers):
    """nn.Linear-style init (uniform +/- 1/sqrt(in_features)), stacked ONCE.

    Weights stay in PyTorch (out_features, in_features) layout, stacked to
    (L, dim, dim) and cast to bf16 for the MXU.  Biases stacked to (L, 1, dim)
    in f32.  Stacking/casting happens once here, outside the jitted forward.
    """
    bound = 1.0 / (dim ** 0.5)
    ws, bs = [], []
    for layer_num in range(n_layers):
        kw, kb = jax.random.split(jax.random.fold_in(key, layer_num))
        ws.append(jax.random.uniform(kw, (dim, dim), jnp.float32, -bound, bound))
        bs.append(jax.random.uniform(kb, (dim,), jnp.float32, -bound, bound))
    w_stack = jnp.stack(ws).astype(jnp.bfloat16)
    b_stack = jnp.stack(bs)[:, None, :]
    return w_stack, b_stack


@jax.jit
def encoder_forward(x, w_stack, b_stack):
    """Equivalent of Encoder.forward(x) with dropout=0.0 (module default)."""
    return _encoder_pallas(x, w_stack, b_stack)


if __name__ == "__main__":
    key = jax.random.PRNGKey(0)
    batch, dim, n_layers = 256, 128, 3   # lane-dense dim, >1 batch tile

    k_x, k_p = jax.random.split(key)
    x = jax.random.normal(k_x, (batch, dim), jnp.float32)
    w_stack, b_stack = init_encoder_params(k_p, dim, n_layers)

    out = jax.block_until_ready(encoder_forward(x, w_stack, b_stack))

    # Pure-JAX reference of the same forward (bf16 operands, f32 accumulate).
    ref = x
    for i in range(n_layers):
        ref = lax.dot_general(
            ref.astype(jnp.bfloat16),
            w_stack[i],
            dimension_numbers=(((1,), (1,)), ((), ())),
            preferred_element_type=jnp.float32,
        ) + b_stack[i, 0]

    assert out.shape == (batch, dim)
    assert jnp.allclose(out, ref, atol=1e-3, rtol=1e-3), "mismatch vs reference"

    print("KERNEL_OK")
</pallas_src>

<mosaic_0001>
module attributes {stable_mosaic.version = 11 : i64} {
  func.func @_encoder_kernel(%arg0: i32, %arg1: i32, %arg2: memref<128x128xf32, #tpu.memory_space<vmem>>, %arg3: memref<1x128x128xbf16, #tpu.memory_space<vmem>>, %arg4: memref<1x1x128xf32, #tpu.memory_space<vmem>>, %arg5: memref<128x128xf32, #tpu.memory_space<vmem>>, %arg6: memref<128x128xf32, #tpu.memory_space<vmem>>) attributes {dimension_semantics = [#tpu.dimension_semantics<parallel>, #tpu.dimension_semantics<arbitrary>], iteration_bounds = array<i64: 2, 3>, scalar_prefetch = 0 : i64, scratch_operands = 1 : i64, tpu.core_type = #tpu.core_type<tc>, window_params = [{transform_indices = @transform_0, window_bounds = array<i64: 128, 128>}, {transform_indices = @transform_1, window_bounds = array<i64: 1, 128, 128>}, {transform_indices = @transform_2, window_bounds = array<i64: 1, 1, 128>}, {transform_indices = @transform_3, window_bounds = array<i64: 128, 128>}]} {
    %c0_i32 = arith.constant 0 : i32
    %0 = arith.cmpi eq, %arg1, %c0_i32 : i32
    %1 = arith.extui %0 : i1 to i32
    %c0_i32_0 = arith.constant 0 : i32
    %2 = arith.cmpi ne, %1, %c0_i32_0 : i32
    scf.if %2 {
      %c0_11 = arith.constant 0 : index
      %c0_12 = arith.constant 0 : index
      %16 = vector.load %arg2[%c0_11, %c0_12] : memref<128x128xf32, #tpu.memory_space<vmem>>, vector<128x128xf32>
      %c0_13 = arith.constant 0 : index
      %c0_14 = arith.constant 0 : index
      %17 = vector.load %arg6[%c0_13, %c0_14] : memref<128x128xf32, #tpu.memory_space<vmem>>, vector<128x128xf32>
      tpu.vector_store %arg6[%c0_13, %c0_14], %16 {strides = array<i32>} : memref<128x128xf32, #tpu.memory_space<vmem>>, vector<128x128xf32>,
    } else {
    }
    %c0 = arith.constant 0 : index
    %c0_1 = arith.constant 0 : index
    %3 = vector.load %arg6[%c0, %c0_1] : memref<128x128xf32, #tpu.memory_space<vmem>>, vector<128x128xf32>
    %4 = arith.truncf %3 : vector<128x128xf32> to vector<128x128xbf16>
    %c0_2 = arith.constant 0 : index
    %c0_3 = arith.constant 0 : index
    %c0_4 = arith.constant 0 : index
    %5 = vector.load %arg3[%c0_2, %c0_3, %c0_4] : memref<1x128x128xbf16, #tpu.memory_space<vmem>>, vector<1x128x128xbf16>
    %6 = vector.shape_cast %5 : vector<1x128x128xbf16> to vector<128x128xbf16>
    %cst = arith.constant dense<0.000000e+00> : vector<128x128xf32>
    %7 = tpu.matmul %4, %6, %cst {dimension_numbers = #tpu.dot_dimension_numbers<[1], [1], [0], [0], [0, 0, 1, 0], [], []>} : vector<128x128xbf16>, vector<128x128xbf16>, vector<128x128xf32> -> vector<128x128xf32>
    %c0_5 = arith.constant 0 : index
    %c0_6 = arith.constant 0 : index
    %c0_7 = arith.constant 0 : index
    %8 = vector.load %arg4[%c0_5, %c0_6, %c0_7] : memref<1x1x128xf32, #tpu.memory_space<vmem>>, vector<1x1x128xf32>
    %9 = vector.shape_cast %8 : vector<1x1x128xf32> to vector<1x128xf32>
    %10 = vector.broadcast %9 : vector<1x128xf32> to vector<128x128xf32>
    %11 = arith.addf %7, %10 : vector<128x128xf32>
    %c0_8 = arith.constant 0 : index
    %c0_9 = arith.constant 0 : index
    %12 = vector.load %arg6[%c0_8, %c0_9] : memref<128x128xf32, #tpu.memory_space<vmem>>, vector<128x128xf32>
    tpu.vector_store %arg6[%c0_8, %c0_9], %11 {strides = array<i32>} : memref<128x128xf32, #tpu.memory_space<vmem>>, vector<128x128xf32>,
    %c2_i32 = arith.constant 2 : i32
    %13 = arith.cmpi eq, %arg1, %c2_i32 : i32
    %14 = arith.extui %13 : i1 to i32
    %c0_i32_10 = arith.constant 0 : i32
    %15 = arith.cmpi ne, %14, %c0_i32_10 : i32
    scf.if %15 {
      %c0_11 = arith.constant 0 : index
      %c0_12 = arith.constant 0 : index
      %16 = vector.load %arg6[%c0_11, %c0_12] : memref<128x128xf32, #tpu.memory_space<vmem>>, vector<128x128xf32>
      %c0_13 = arith.constant 0 : index
      %c0_14 = arith.constant 0 : index
      %17 = vector.load %arg5[%c0_13, %c0_14] : memref<128x128xf32, #tpu.memory_space<vmem>>, vector<128x128xf32>
      tpu.vector_store %arg5[%c0_13, %c0_14], %16 {strides = array<i32>} : memref<128x128xf32, #tpu.memory_space<vmem>>, vector<128x128xf32>,
    } else {
    }
    return
  }
  func.func @transform_0(%arg0: i32, %arg1: i32) -> (i32, i32) {
    %c0_i32 = arith.constant 0 : i32
    %c0_i32_0 = arith.constant 0 : i32
    return %arg0, %c0_i32 : i32, i32
  }
  func.func @transform_1(%arg0: i32, %arg1: i32) -> (i32, i32, i32) {
    %c0_i32 = arith.constant 0 : i32
    %c0_i32_0 = arith.constant 0 : i32
    %c0_i32_1 = arith.constant 0 : i32
    return %arg1, %c0_i32, %c0_i32_0 : i32, i32, i32
  }
  func.func @transform_2(%arg0: i32, %arg1: i32) -> (i32, i32, i32) {
    %c0_i32 = arith.constant 0 : i32
    %c0_i32_0 = arith.constant 0 : i32
    %c0_i32_1 = arith.constant 0 : i32
    return %arg1, %c0_i32, %c0_i32_0 : i32, i32, i32
  }
  func.func @transform_3(%arg0: i32, %arg1: i32) -> (i32, i32) {
    %c0_i32 = arith.constant 0 : i32
    %c0_i32_0 = arith.constant 0 : i32
    return %arg0, %c0_i32 : i32, i32
  }
}

</mosaic_0001>

<bundles_post_ra>
// kernel: encoder_forward.1
= control target key start
LH: loop header
LB: loop body
LE: loop exit
PB: predicated region body
PF: predicated region fallthrough
CT: control target
= control target key end

     0   :  { %s1391_s0 = inlined_call_operand.hbm [shape: f32[256,128], index: 0, kind: input, shape index: {}]   ;;  %s1392_s1 = inlined_call_operand.hbm [shape: bf16[3,128,128], index: 1, kind: input, shape index: {}]   ;;  %s1393_s2 = inlined_call_operand.hbm [shape: f32[3,1,128], index: 2, kind: input, shape index: {}]   ;;  %s1394_s3 = inlined_call_operand.hbm [shape: f32[256,128], index: 3, kind: output, shape index: {}]  }
   0x1   :  { %1404 = sst [smem:[#allocation22_spill]] %s1392_s1 }
   0x2   :  { %1405 = sst [smem:[#allocation23_spill]] %s1394_s3 }
   0x3   :  { %8 = vsyncpa [#allocation4], 0 }
   0x4   :  { %10 = vsyncpa [#allocation4 + $0x1], 0 }
   0x5   :  { %11 = vsyncpa [#allocation7], 0 }
   0x6   :  { %13 = vsyncpa [#allocation7 + $0x1], 0 }
   0x7   :  { %14 = vsyncpa [#allocation5], 0 }
   0x8   :  { %16 = vsyncpa [#allocation5 + $0x1], 0  ;;  %s1098_s12 = smov 0   ;;  %s1100_s13 = smov 0  }
   0x9   :  { %s1102_s14 = smov 0   ;;  %s1104_s15 = smov 0  }
   0xa   :  { %s1106_s16 = smov 0   ;;  %s1108_s17 = smov 0  }
   0xb   :  { %s1110_s18 = smov 0   ;;  %s1112_s19 = smov 0  }
   0xc   :  { %s1114_s20 = smov 0   ;;  %s1116_s21 = smov 0  }
   0xd   :  { %s1118_s22 = smov 0  }
   0xe LB: > { %1406 = sst [smem:[#allocation13_spill]] %s1042_s15  ;;  %s1152_s23 = sadd.s32 4294967295, %s1070_s22   ;;  %s1070_s22 = sphi %s1118_s22, %s22_s22   ;;  %s1066_s21 = sphi %s1116_s21, %s1436_s21   ;;  %s1062_s20 = sphi %s1114_s20, %s1443_s20   ;;  %s1058_s19 = sphi %s1112_s19, %s1434_s19   ;;  %s1054_s18 = sphi %s1110_s18, %s1442_s18   ;;  %s1050_s17 = sphi %s1108_s17, %s1433_s17   ;;  %s1046_s16 = sphi %s1106_s16, %s1441_s16   ;;  %s1042_s15 = sphi %s1104_s15, %s1440_s15   ;;  %s1038_s14 = sphi %s1102_s14, %s1439_s14   ;;  %s1034_s13 = sphi %s1100_s13, %s1438_s13   ;;  %s1030_s12 = sphi %s1098_s12, %s1437_s12  }
   0xf   : > { %1407 = sst [smem:[#allocation14_spill]] %s1050_s17  ;;  %s31_s24 = sadd.s32 1, %s1062_s20 }
  0x10   : > { %1408 = sst [smem:[#allocation15_spill]] %s1058_s19  ;;  %p1155_p0 = scmp.ge.s32.totalorder %s31_s24, 3 }
  0x11   : > { %1409 = sst [smem:[#allocation16_spill]] %s1066_s21  ;;  %p49_p1 = scmp.eq.s32.totalorder %s1070_s22, 0 }
  0x12   : > { %p55_p2 = scmp.eq.s32.totalorder %s1152_s23, 0  ;;  %s67_s26 = sadd.s32 1, %s1038_s14 }
  0x13   : > { %s1445_s24 = smov (%p1155_p0, %s31_s24), 0  ;;  %p74_p3 = scmp.ne.s32.totalorder %s1038_s14, %s1034_s13 }
  0x14   : > { %1411 = sst [smem:[#allocation17_spill]] %s1445_s24  ;;  %p80_p4 = scmp.ne.s32.totalorder %s1034_s13, %s1030_s12 }
  0x15   : > { %s64_s27 = ssub.s32 %s1062_s20, %s1445_s24  ;;  %p1173_p6 = por %p74_p3, %p49_p1 }
  0x16   : > { %p65_p5 = scmp.eq.s32.totalorder %s64_s27, 0  ;;  %p1179_p7 = por %p80_p4, %p55_p2 }
  0x17   : > { %p1395_p8 = scmp.lt.s32.totalorder %s1070_s22, 6  ;;  %s178_s4 = sand.u32 1, %s1070_s22  }
  0x18   : > { %s1185_s30 = scalar_select %p65_p5, %s1038_s14, %s67_s26  }
  0x19   : > { %s1396_s5 = sand.u32 1, %s1038_s14   ;;  %s701_s7 = sshll.u32 %s1062_s20, 6 }
  0x1a   : > { %1414 = sst [smem:[#allocation18_spill]] %s1185_s30  ;;  %s654_s6 = sshll.u32 %s1396_s5, 6 }
  0x1b   : > { %s1415_s1 = sld [smem:[#allocation22_spill]]  ;;  %s182_s11 = scalar_lea.vmem [#allocation6], %s654_s6 }
  0x1c   : > { %s190_s12 = sshll.u32 %s182_s11, 4  ;;  %p1199_p9 = pnand %p1395_p8, %p1173_p6  ;;  %s191_s12 = int_to_ptr.vmem [resolvable:$true] %s190_s12 }
  0x1d   : > { %p657_p10 = scmp.ge.s32.totalorder %s1070_s22, 1  ;;  %s1204_s6 = scalar_lea.sflag [#allocation7], %s178_s4 }
  0x1e   : > { %s1073_s8 = smov 4   ;;  %p215_p11 = scmp.lt.s32.totalorder %s1070_s22, 7 }
  0x1f   : > { %s648_s9 = sadd.s32 4294967294, %s1070_s22   ;;  %s41_s4 = sadd.s32 1, %s1050_s17 }
  0x20   : > { %p1210_p12 = pnand %p657_p10, %p215_p11  ;;  %p48_p13 = scmp.ne.s32.totalorder %s1050_s17, %s1046_s16 }
  0x21   : > { %s187_s10 = scalar_lea.hbm %s1415_s1, %s701_s7  ;;  %s1072_s7 = smov 64  }
  0x22   : > { %s188_s26 = sshll.u32 %s187_s10, 4  ;;  %s34_s10 = sadd.s32 1, %s1066_s21  ;;  %s189_s26 = int_to_ptr.hbm [resolvable:$true] %s188_s26 }
  0x23   : > { %749 = dma.hbm_to_vmem [thread:$0]  (!%p1199_p9), %s189_s26, 1024, %s191_s12, %s1204_s6, %s1072_s7, %s1072_s7, %s1073_s8  }
  0x24   : > { %s1447_s10 = smov (!%p1155_p0, %s34_s10), %s1066_s21  ;;  %p54_p4 = scmp.ne.s32.totalorder %s1046_s16, %s1042_s15 }
  0x25   : > { %p36_p3 = scmp.ge.s32.totalorder %s1447_s10, 2  ;;  %p1226_p5 = por %p49_p1, %p48_p13 }
  0x26   : > { %p130_p6 = scmp.eq.s32.totalorder %s1152_s23, 5  ;;  %p1235_p10 = por %p55_p2, %p54_p4 }
  0x27   : > { %s1449_s10 = smov (%p36_p3, %s1447_s10), 0  ;;  %p136_p1 = scmp.eq.s32.totalorder %s648_s9, 5 }
  0x28   : > { %1419 = sst [smem:[#allocation19_spill]] %s1449_s10  ;;  %p1239_p0 = por %p130_p6, %p48_p13 }
  0x29   : > { %s38_s26 = ssub.s32 %s1066_s21, %s1449_s10  ;;  %s156_s7 = sand.u32 1, %s1050_s17  }
  0x2a   : > { %p39_p11 = scmp.eq.s32.totalorder %s38_s26, 0  ;;  %p1246_p8 = por %p136_p1, %p54_p4 }
  0x2b   : > { %s651_s1 = sshll.u32 %s156_s7, 7  ;;  %s700_s24 = sshll.u32 %s1066_s21, 7 }
  0x2c   : > { %s1422_s8 = scalar_select %p1246_p8, 1, 0 }
  0x2d   : > { %s1251_s5 = scalar_select %p39_p11, %s1050_s17, %s41_s4  }
  0x2e   : > { %1423 = sst [smem:[#allocation20_spill]] %s1422_s8  ;;  %s165_s3 = scalar_lea.hbm %s1391_s0, %s700_s24 }
  0x2f   : > { %1424 = sst [smem:[#allocation21_spill]] %s1251_s5  ;;  %s166_s19 = sshll.u32 %s165_s3, 4  ;;  %s167_s19 = int_to_ptr.hbm [resolvable:$true] %s166_s19 }
  0x30   : > { %s160_s10 = scalar_lea.vmem [#allocation3], %s651_s1  ;;  %p1425_p2 = scmp.lt.s32.totalorder %s1070_s22, 6 }
  0x31   : > { %s168_s9 = sshll.u32 %s160_s10, 4  ;;  %s206_s5 = scalar_lea.hbm %s1393_s2, %s1062_s20  ;;  %s169_s9 = int_to_ptr.vmem [resolvable:$true] %s168_s9 }
  0x32   : > { %p744_p13 = pnand %p1425_p2, %p1226_p5  ;;  %s157_s17 = scalar_lea.sflag [#allocation4], %s156_s7 }
  0x33   : > { %s1074_s21 = smov 128   ;;  %s1075_s8 = smov 8  }
  0x34   : > { %746 = dma.hbm_to_vmem [thread:$0]  (!%p744_p13), %s167_s19, 2048, %s169_s9, %s157_s17, %s1074_s21, %s1074_s21, %s1075_s8  }
  0x35   : > { %s208_s15 = sshll.u32 %s206_s5, 4  ;;  %s1426_s24 = sand.u32 1, %s1038_s14   ;;  %s209_s15 = int_to_ptr.hbm [resolvable:$true] %s208_s15 }
  0x36   : > { %s203_s3 = scalar_lea.vmem [#allocation8], %s1426_s24  ;;  %219 = sbr.rel (%p1210_p12) target bundleno = 353 (0x161), region = 32 }
  0x37   : > { %s210_s30 = sshll.u32 %s203_s3, 4  ;;  %s1273_s1 = sand.u32 (!%p1210_p12), 1, %s1046_s16   ;;  %s211_s30 = int_to_ptr.vmem [resolvable:$true] %s210_s30 }
  0x38   : > { %752 = dma.hbm_to_vmem [thread:$0]  (!%p1199_p9), %s209_s15, 16, %s211_s30, %s1204_s6  }
  0x39   : > { %s658_s10 = sshll.u32 (!%p1210_p12), %s1273_s1, 7  ;;  %s222_s11 = scalar_lea.sflag (!%p1210_p12), [#allocation4], %s1273_s1 }
  0x3a   : > { %s1277_s17 = scalar_lea.vmem (!%p1210_p12), [#allocation3], %s658_s10 }
  0x3b   : > { %1017 = dma.done.wait (%p1235_p10), %s222_s11, 2048  }
  0x3c   : > { %1019 = vsyncadd (%p1235_p10), %s222_s11, 4294965248  ;;  %s231_s19 = sand.u32 1, %s1152_s23   ;;  %s233_s21 = sand.u32 1, %s1034_s13  }
  0x3d   : > { %s659_s5 = sshll.u32 %s233_s21, 6  ;;  %s232_s27 = scalar_lea.sflag [#allocation7], %s231_s19 }
  0x3e   : > { %s1285_s6 = scalar_lea.vmem [#allocation6], %s659_s5 }
  0x3f   : > { %1021 = dma.done.wait (%p1179_p7), %s232_s27, 1040  }
  0x40   : > { %1023 = vsyncadd (%p1179_p7), %s232_s27, 4294966256  ;;  %s1291_s28 = scalar_lea.vmem [#allocation8], %s233_s21  ;;  %s1293_s7 = scalar_lea.vmem [#allocation9], %s658_s10 }
  0x41   : > { %p661_p9 = scmp.ne.s32.totalorder %s1054_s18, 0 }
  0x43   : > { %282 = sbr.rel (%p661_p9) target bundleno = 89 (0x59), region = 48 }
  0x48   : > { %v283_v0 = vld [vmem:[%s1277_s17] sm:$0xff]  ;;  %v284_v1 = vld [vmem:[%s1277_s17 + $0x8] sm:$0xff]  ;;  %v285_v2 = vld [vmem:[%s1277_s17 + $0x10] sm:$0xff] }
  0x49   : > { %299 = vst [vmem:[#allocation2 + $0x30] sm:$0xff] %v283_v0  ;;  %v286_v3 = vld [vmem:[%s1277_s17 + $0x18] sm:$0xff]  ;;  %v287_v4 = vld [vmem:[%s1277_s17 + $0x20] sm:$0xff]  ;;  %v288_v5 = vld [vmem:[%s1277_s17 + $0x28] sm:$0xff] }
  0x4a   : > { %300 = vst [vmem:[#allocation2] sm:$0xff] %v284_v1  ;;  %v289_v6 = vld [vmem:[%s1277_s17 + $0x30] sm:$0xff]  ;;  %v290_v7 = vld [vmem:[%s1277_s17 + $0x38] sm:$0xff]  ;;  %v291_v8 = vld [vmem:[%s1277_s17 + $0x40] sm:$0xff] }
  0x4b   : > { %301 = vst [vmem:[#allocation2 + $0x58] sm:$0xff] %v285_v2  ;;  %v292_v9 = vld [vmem:[%s1277_s17 + $0x48] sm:$0xff]  ;;  %v293_v10 = vld [vmem:[%s1277_s17 + $0x50] sm:$0xff]  ;;  %v294_v11 = vld [vmem:[%s1277_s17 + $0x58] sm:$0xff] }
  0x4c   : > { %302 = vst [vmem:[#allocation2 + $0x18] sm:$0xff] %v286_v3  ;;  %v295_v12 = vld [vmem:[%s1277_s17 + $0x60] sm:$0xff]  ;;  %v296_v13 = vld [vmem:[%s1277_s17 + $0x68] sm:$0xff]  ;;  %v297_v14 = vld [vmem:[%s1277_s17 + $0x70] sm:$0xff] }
  0x4d   : > { %303 = vst [vmem:[#allocation2 + $0x50] sm:$0xff] %v287_v4  ;;  %v298_v15 = vld [vmem:[%s1277_s17 + $0x78] sm:$0xff] }
  0x4e   : > { %304 = vst [vmem:[#allocation2 + $0x68] sm:$0xff] %v288_v5 }
  0x4f   : > { %305 = vst [vmem:[#allocation2 + $0x8] sm:$0xff] %v289_v6 }
  0x50   : > { %306 = vst [vmem:[#allocation2 + $0x48] sm:$0xff] %v290_v7 }
  0x51   : > { %307 = vst [vmem:[#allocation2 + $0x40] sm:$0xff] %v291_v8 }
  0x52   : > { %308 = vst [vmem:[#allocation2 + $0x20] sm:$0xff] %v292_v9 }
  0x53   : > { %309 = vst [vmem:[#allocation2 + $0x10] sm:$0xff] %v293_v10 }
  0x54   : > { %310 = vst [vmem:[#allocation2 + $0x38] sm:$0xff] %v294_v11 }
  0x55   : > { %311 = vst [vmem:[#allocation2 + $0x60] sm:$0xff] %v295_v12 }
  0x56   : > { %312 = vst [vmem:[#allocation2 + $0x70] sm:$0xff] %v296_v13 }
  0x57   : > { %313 = vst [vmem:[#allocation2 + $0x78] sm:$0xff] %v297_v14 }
  0x58   : > { %314 = vst [vmem:[#allocation2 + $0x28] sm:$0xff] %v298_v15 }
  0x59 PF: > { %v709_v16 = vld [vmem:[%s1285_s6 + $0x38] sm:$0xff]  ;;  %v708_v17 = vld [vmem:[%s1285_s6 + $0x30] sm:$0xff]  ;;  %v707_v18 = vld [vmem:[%s1285_s6 + $0x28] sm:$0xff]  ;;  %p694_p7 = scmp.ne.s32.totalorder %s1054_s18, 2 }
  0x5a   : > { %407 = vmatpush.bf16.xpose.msra.mxu0 %v709_v16  ;;  %711 = vmatpush.bf16.xpose.msra.mxu1 %v709_v16  ;;  %v706_v19 = vld [vmem:[%s1285_s6 + $0x20] sm:$0xff]  ;;  %v705_v20 = vld [vmem:[%s1285_s6 + $0x18] sm:$0xff]  ;;  %v704_v21 = vld [vmem:[%s1285_s6 + $0x10] sm:$0xff] }
  0x5b   : > { %712 = vmatpush.bf16.xpose.msra.mxu2 %v709_v16  ;;  %713 = vmatpush.bf16.xpose.msra.mxu3 %v709_v16  ;;  %v703_v22 = vld [vmem:[%s1285_s6 + $0x8] sm:$0xff]  ;;  %v702_v23 = vld [vmem:[%s1285_s6] sm:$0xff]  ;;  %v315_v24 = vld [vmem:[#allocation2 + $0x30] sm:$0xff] }
  0x5c   : > { %v316_v25 = vld [vmem:[#allocation2] sm:$0xff]  ;;  %v319_v26 = vld [vmem:[#allocation2 + $0x50] sm:$0xff]  ;;  %v320_v27 = vld [vmem:[#allocation2 + $0x68] sm:$0xff] }
  0x5d   : > { %v323_v28 = vld [vmem:[#allocation2 + $0x40] sm:$0xff]  ;;  %v328_v31 = vld [vmem:[#allocation2 + $0x70] sm:$0xff]  ;;  %v331_v32 = vpack.c.bf16 %v316_v25, %v315_v24  ;;  %v333_v33 = vpack.c.bf16 %v320_v27, %v319_v26  ;;  %v317_v36 = vld [vmem:[#allocation2 + $0x58] sm:$0xff] }
  0x5e   : > { %v324_v29 = vld [vmem:[#allocation2 + $0x20] sm:$0xff]  ;;  %v318_v37 = vld [vmem:[#allocation2 + $0x18] sm:$0xff]  ;;  %v321_v38 = vld [vmem:[#allocation2 + $0x8] sm:$0xff] }
  0x5f   : > { %v327_v30 = vld [vmem:[#allocation2 + $0x60] sm:$0xff]  ;;  %v335_v34 = vpack.c.bf16 %v324_v29, %v323_v28  ;;  %v322_v39 = vld [vmem:[#allocation2 + $0x48] sm:$0xff]  ;;  %v325_v40 = vld [vmem:[#allocation2 + $0x10] sm:$0xff]  ;;  %v332_v44 = vpack.c.bf16 %v318_v37, %v317_v36 }
  0x60   : > { %v337_v35 = vpack.c.bf16 %v328_v31, %v327_v30  ;;  %v326_v41 = vld [vmem:[#allocation2 + $0x38] sm:$0xff]  ;;  %v330_v43 = vld [vmem:[#allocation2 + $0x28] sm:$0xff]  ;;  %v334_v45 = vpack.c.bf16 %v322_v39, %v321_v38  ;;  %v853_v48 = vld [vmem:[%s1291_s28] ss:$0 sm:$0xff] }
  0x61   : > { %v329_v42 = vld [vmem:[#allocation2 + $0x78] sm:$0xff]  ;;  %v336_v46 = vpack.c.bf16 %v326_v41, %v325_v40 }
  0x62   : > { %408 = vmatpush.bf16.xpose.msra.mxu0 %v708_v17  ;;  %714 = vmatpush.bf16.xpose.msra.mxu1 %v708_v17  ;;  %v338_v47 = vpack.c.bf16 %v330_v43, %v329_v42 }
  0x63   : > { %715 = vmatpush.bf16.xpose.msra.mxu2 %v708_v17  ;;  %716 = vmatpush.bf16.xpose.msra.mxu3 %v708_v17 }
  0x6a   : > { %409 = vmatpush.bf16.xpose.msra.mxu0 %v707_v18  ;;  %717 = vmatpush.bf16.xpose.msra.mxu1 %v707_v18 }
  0x6b   : > { %718 = vmatpush.bf16.xpose.msra.mxu2 %v707_v18  ;;  %719 = vmatpush.bf16.xpose.msra.mxu3 %v707_v18 }
  0x72   : > { %410 = vmatpush.bf16.xpose.msra.mxu0 %v706_v19  ;;  %720 = vmatpush.bf16.xpose.msra.mxu1 %v706_v19 }
  0x73   : > { %721 = vmatpush.bf16.xpose.msra.mxu2 %v706_v19  ;;  %722 = vmatpush.bf16.xpose.msra.mxu3 %v706_v19 }
  0x7a   : > { %411 = vmatpush.bf16.xpose.msra.mxu0 %v705_v20  ;;  %723 = vmatpush.bf16.xpose.msra.mxu1 %v705_v20 }
  0x7b   : > { %724 = vmatpush.bf16.xpose.msra.mxu2 %v705_v20  ;;  %725 = vmatpush.bf16.xpose.msra.mxu3 %v705_v20 }
  0x82   : > { %412 = vmatpush.bf16.xpose.msra.mxu0 %v704_v21  ;;  %726 = vmatpush.bf16.xpose.msra.mxu1 %v704_v21 }
  0x83   : > { %727 = vmatpush.bf16.xpose.msra.mxu2 %v704_v21  ;;  %728 = vmatpush.bf16.xpose.msra.mxu3 %v704_v21 }
  0x8a   : > { %413 = vmatpush.bf16.xpose.msra.mxu0 %v703_v22  ;;  %729 = vmatpush.bf16.xpose.msra.mxu1 %v703_v22 }
  0x8b   : > { %730 = vmatpush.bf16.xpose.msra.mxu2 %v703_v22  ;;  %731 = vmatpush.bf16.xpose.msra.mxu3 %v703_v22 }
  0x92   : > { %414 = vmatpush.bf16.xpose.msra.mxu0 %v702_v23  ;;  %732 = vmatpush.bf16.xpose.msra.mxu1 %v702_v23 }
  0x93   : > { %733 = vmatpush.bf16.xpose.msra.mxu2 %v702_v23  ;;  %734 = vmatpush.bf16.xpose.msra.mxu3 %v702_v23 }
  0x99   : > { %415 = vmatmul.bf16.vlgmr.msra.gmra.mxu0 %v331_v32  ;;  %425 = vmatmul.bf16.vlgmr.msra.gmra.mxu1 %v333_v33 }
  0x9a   : > { %435 = vmatmul.bf16.vlgmr.msra.gmra.mxu2 %v335_v34  ;;  %445 = vmatmul.bf16.vlgmr.msra.gmra.mxu3 %v337_v35 }
  0xa9   : > { %420 = vmatmul.bf16.gmra.mxu0 %v332_v44  ;;  %430 = vmatmul.bf16.gmra.mxu1 %v334_v45 }
  0xaa   : > { %440 = vmatmul.bf16.gmra.mxu2 %v336_v46  ;;  %450 = vmatmul.bf16.gmra.mxu3 %v338_v47 }
 0x116   : > { %v416_v49 = vpop.f32.mrf.mxu0  ;;  %v426_v50 = vpop.f32.mrf.mxu1 }
 0x117   : > { %v417_v51 = vadd.f32 %v853_v48, %v416_v49  ;;  %v427_v52 = vadd.f32 %v853_v48, %v426_v50 }
 0x119   : > { %456 = vst [vmem:[#allocation2 + $0x30] sm:$0xff] %v417_v51 }
 0x11a   : > { %460 = vst [vmem:[#allocation2 + $0x50] sm:$0xff] %v427_v52 }
 0x11d   : > { %v436_v53 = vpop.f32.mrf.mxu2  ;;  %v446_v54 = vpop.f32.mrf.mxu3 }
 0x11e   : > { %v437_v55 = vadd.f32 %v853_v48, %v436_v53  ;;  %v447_v56 = vadd.f32 %v853_v48, %v446_v54  ;;  %v418_v57 = vpop.f32.mrf.mxu0  ;;  %v428_v58 = vpop.f32.mrf.mxu1 }
 0x11f   : > { %v419_v59 = vadd.f32 %v853_v48, %v418_v57  ;;  %v429_v60 = vadd.f32 %v853_v48, %v428_v58 }
 0x120   : > { %464 = vst [vmem:[#allocation2 + $0x40] sm:$0xff] %v437_v55 }
 0x121   : > { %468 = vst [vmem:[#allocation2 + $0x60] sm:$0xff] %v447_v56 }
 0x122   : > { %457 = vst [vmem:[#allocation2] sm:$0xff] %v419_v59 }
 0x123   : > { %461 = vst [vmem:[#allocation2 + $0x68] sm:$0xff] %v429_v60 }
 0x125   : > { %v438_v61 = vpop.f32.mrf.mxu2  ;;  %v448_v62 = vpop.f32.mrf.mxu3 }
 0x126   : > { %v439_v63 = vadd.f32 %v853_v48, %v438_v61  ;;  %v449_v0 = vadd.f32 %v853_v48, %v448_v62  ;;  %v421_v1 = vpop.f32.mrf.mxu0  ;;  %v431_v2 = vpop.f32.mrf.mxu1 }
 0x127   : > { %v422_v3 = vadd.f32 %v853_v48, %v421_v1  ;;  %v432_v4 = vadd.f32 %v853_v48, %v431_v2 }
 0x128   : > { %465 = vst [vmem:[#allocation2 + $0x20] sm:$0xff] %v439_v63 }
 0x129   : > { %469 = vst [vmem:[#allocation2 + $0x70] sm:$0xff] %v449_v0 }
 0x12a   : > { %458 = vst [vmem:[#allocation2 + $0x58] sm:$0xff] %v422_v3 }
 0x12b   : > { %462 = vst [vmem:[#allocation2 + $0x8] sm:$0xff] %v432_v4 }
 0x12d   : > { %v441_v5 = vpop.f32.mrf.mxu2  ;;  %v451_v6 = vpop.f32.mrf.mxu3 }
 0x12e   : > { %v442_v7 = vadd.f32 %v853_v48, %v441_v5  ;;  %v452_v8 = vadd.f32 %v853_v48, %v451_v6  ;;  %v423_v9 = vpop.f32.mrf.mxu0  ;;  %v433_v10 = vpop.f32.mrf.mxu1 }
 0x12f   : > { %v424_v11 = vadd.f32 %v853_v48, %v423_v9  ;;  %v434_v12 = vadd.f32 %v853_v48, %v433_v10 }
 0x130   : > { %466 = vst [vmem:[#allocation2 + $0x10] sm:$0xff] %v442_v7 }
 0x131   : > { %470 = vst [vmem:[#allocation2 + $0x78] sm:$0xff] %v452_v8 }
 0x132   : > { %459 = vst [vmem:[#allocation2 + $0x18] sm:$0xff] %v424_v11 }
 0x133   : > { %463 = vst [vmem:[#allocation2 + $0x48] sm:$0xff] %v434_v12 }
 0x135   : > { %v443_v13 = vpop.f32.mrf.mxu2  ;;  %v453_v14 = vpop.f32.mrf.mxu3  ;;  %475 = sbr.rel (%p694_p7) target bundleno = 331 (0x14b), region = 52 }
 0x136   : > { %v444_v15 = vadd.f32 %v853_v48, %v443_v13  ;;  %v454_v16 = vadd.f32 %v853_v48, %v453_v14 }
 0x138   : > { %467 = vst [vmem:[#allocation2 + $0x38] sm:$0xff] %v444_v15 }
 0x139   : > { %471 = vst [vmem:[#allocation2 + $0x28] sm:$0xff] %v454_v16 }
 0x13a   : > { %v476_v17 = vld [vmem:[#allocation2 + $0x30] sm:$0xff]  ;;  %v477_v18 = vld [vmem:[#allocation2] sm:$0xff]  ;;  %v478_v19 = vld [vmem:[#allocation2 + $0x58] sm:$0xff] }
 0x13b   : > { %492 = vst [vmem:[%s1293_s7] sm:$0xff] %v476_v17  ;;  %v479_v20 = vld [vmem:[#allocation2 + $0x18] sm:$0xff]  ;;  %v480_v21 = vld [vmem:[#allocation2 + $0x50] sm:$0xff]  ;;  %v481_v22 = vld [vmem:[#allocation2 + $0x68] sm:$0xff] }
 0x13c   : > { %493 = vst [vmem:[%s1293_s7 + $0x8] sm:$0xff] %v477_v18  ;;  %v482_v23 = vld [vmem:[#allocation2 + $0x8] sm:$0xff]  ;;  %v484_v25 = vld [vmem:[#allocation2 + $0x40] sm:$0xff]  ;;  %v486_v27 = vld [vmem:[#allocation2 + $0x10] sm:$0xff] }
 0x13d   : > { %494 = vst [vmem:[%s1293_s7 + $0x10] sm:$0xff] %v478_v19  ;;  %v483_v24 = vld [vmem:[#allocation2 + $0x48] sm:$0xff]  ;;  %v485_v26 = vld [vmem:[#allocation2 + $0x20] sm:$0xff]  ;;  %v489_v30 = vld [vmem:[#allocation2 + $0x70] sm:$0xff] }
 0x13e   : > { %495 = vst [vmem:[%s1293_s7 + $0x18] sm:$0xff] %v479_v20  ;;  %v488_v29 = vld [vmem:[#allocation2 + $0x60] sm:$0xff]  ;;  %v490_v31 = vld [vmem:[#allocation2 + $0x78] sm:$0xff] }
 0x13f   : > { %496 = vst [vmem:[%s1293_s7 + $0x20] sm:$0xff] %v480_v21  ;;  %v487_v28 = vld [vmem:[#allocation2 + $0x38] sm:$0xff] }
 0x140   : > { %497 = vst [vmem:[%s1293_s7 + $0x28] sm:$0xff] %v481_v22  ;;  %v491_v32 = vld [vmem:[#allocation2 + $0x28] sm:$0xff] }
 0x141   : > { %498 = vst [vmem:[%s1293_s7 + $0x30] sm:$0xff] %v482_v23 }
 0x142   : > { %499 = vst [vmem:[%s1293_s7 + $0x38] sm:$0xff] %v483_v24 }
 0x143   : > { %500 = vst [vmem:[%s1293_s7 + $0x40] sm:$0xff] %v484_v25 }
 0x144   : > { %501 = vst [vmem:[%s1293_s7 + $0x48] sm:$0xff] %v485_v26 }
 0x145   : > { %502 = vst [vmem:[%s1293_s7 + $0x50] sm:$0xff] %v486_v27 }
 0x146   : > { %503 = vst [vmem:[%s1293_s7 + $0x58] sm:$0xff] %v487_v28 }
 0x147   : > { %504 = vst [vmem:[%s1293_s7 + $0x60] sm:$0xff] %v488_v29 }
 0x148   : > { %505 = vst [vmem:[%s1293_s7 + $0x68] sm:$0xff] %v489_v30 }
 0x149   : > { %506 = vst [vmem:[%s1293_s7 + $0x70] sm:$0xff] %v490_v31 }
 0x14a   : > { %507 = vst [vmem:[%s1293_s7 + $0x78] sm:$0xff] %v491_v32 }
 0x14b PF: > { %s1427_s18 = sld [smem:[#allocation15_spill]]  ;;  %s521_s26 = sshll.u32 %s1293_s7, 4  ;;  %s522_s26 = int_to_ptr.vmem [resolvable:$true] %s521_s26 }
 0x14c   : > { %s1428_s8 = sld [smem:[#allocation23_spill]]  ;;  %s509_s15 = scalar_lea.sflag [#allocation5], %s1273_s1 }
 0x151   : > { %s710_s23 = sshll.u32 %s1427_s18, 7 }
 0x152   : > { %s520_s9 = scalar_lea.hbm %s1428_s8, %s710_s23  ;;  %s964_s11 = scalar_lea.hbm %s1428_s8, 256 }
 0x153   : > { %s523_s4 = sshll.u32 %s520_s9, 4  ;;  %s524_s4 = int_to_ptr.hbm [resolvable:$true] %s523_s4 }
 0x154   : > { %s958_s24 = sshra.s32 %s524_s4, 4  ;;  %s959_s24 = int_to_ptr.hbm [resolvable:$true] %s958_s24 }
 0x155   : > { %s960_s3 = scalar_lea.hbm %s959_s24, 128  ;;  %p965_p5 = scmp.lt.s32.totalorder %s959_s24, %s1428_s8 }
 0x156   : > { %p961_p12 = scmp.ne.s32.totalorder %s959_s24, %s960_s3  ;;  %p966_p6 = scmp.lt.s32.totalorder %s964_s11, %s960_s3 }
 0x158   : > { %p962_p3 = pnand %p961_p12, %p1239_p0  ;;  %p967_p10 = por %p966_p6, %p965_p5 }
 0x15a   : > { %p963_p4 = pneg %p962_p3 }
 0x15c   : > { %p968_p1 = pnand %p967_p10, %p963_p4 }
 0x15e   : > { %971 = shalt.err (!%p968_p1)
}
 0x15f   : > { %s1076_s1 = smov 128   ;;  %s1077_s21 = smov 8  }
 0x160   : > { %741 = dma.vmem_to_hbm [thread:$0]  (%p1239_p0), %s522_s26, 2048, %s524_s4, %s509_s15, %s1076_s1, %s1076_s1, %s1077_s21  }
 0x161 PF: > { %s1429_s5 = sld [smem:[#allocation13_spill]]  ;;  %p758_p11 = scmp.ge.s32.totalorder %s1070_s22, 2 }
 0x163   : > { %p754_p2 = pnand %p758_p11, %p1246_p8 }
 0x165   : > { %p755_p13 = pneg %p754_p2 }
 0x167   : > { %s538_s6 = sand.u32 1, %s1429_s5  }
 0x168   : > { %s539_s28 = scalar_lea.sflag [#allocation5], %s538_s6 }
 0x169   : > { %1025 = dma.done.wait (%p755_p13), %s539_s28, 2048  }
 0x16a   : > { %1027 = vsyncadd (%p755_p13), %s539_s28, 4294965248  ;;  %s22_s22 = sadd.s32 1, %s1070_s22   ;;  %s1431_s7 = sld [smem:[#allocation18_spill]] }
 0x16b   : > { %p19_p9 = scmp.ge.s32.totalorder %s22_s22, 8   ;;  %s1432_s25 = sld [smem:[#allocation14_spill]] }
 0x16c   : > { %s1433_s17 = sld [smem:[#allocation21_spill]]  ;;  %s1437_s12 = smov %s1034_s13 }
 0x16d   : > { %s1434_s19 = sld [smem:[#allocation16_spill]]  ;;  %s1438_s13 = smov %s1038_s14 }
 0x16e   : > { %s1435_s23 = sld [smem:[#allocation17_spill]]  ;;  %s1440_s15 = smov %s1046_s16 }
 0x16f   : > { %s1436_s21 = sld [smem:[#allocation19_spill]]  ;;  %s1442_s18 = smov %s1062_s20 }
 0x170   : > { %s1439_s14 = smov %s1431_s7  ;;  %21 = sbr.rel (!%p19_p9) target bundleno = 14 (0xe), region = 109 }
 0x171   : > { %s1441_s16 = smov %s1432_s25 }
 0x174   : > { %s1443_s20 = smov %s1435_s23 }
 0x175   :  { %545 = vsyncpa [#allocation4], 1 }
 0x176   :  { %547 = vsyncpa [#allocation4 + $0x1], 1 }
 0x177   :  { %548 = vsyncpa [#allocation7], 1 }
 0x178   :  { %550 = vsyncpa [#allocation7 + $0x1], 1 }
 0x179   :  { %551 = vsyncpa [#allocation5], 1 }
 0x17a   :  { %553 = vsyncpa [#allocation5 + $0x1], 1 }

</bundles_post_ra>
